<compile_context>
chip_gen: v7x
topology: tpu7x:2x2x1
jax: 0.10.0
libtpu: 0.0.40
codegen_flags: <defaults>
</compile_context>

<pallas_src>
import jax
import jax.numpy as jnp
from jax.experimental import pallas as pl
from jax.experimental.pallas import tpu as pltpu


def _awl_kernel(p_ref, l_ref, out_ref):
    # p_ref, l_ref: (1, num) f32 in VMEM. out_ref: (1,) f32 in SMEM.
    p = p_ref[...]                      # (1, num)
    l = l_ref[...]                      # (1, num)
    p2 = p * p
    weighted = 0.5 * l / p2             # exact divide; VPU slack, zero cost
    reg = jnp.log1p(p2)                 # EUP; log1p for small-param accuracy
    out_ref[0] = jnp.sum(weighted + reg)


def _awl_forward(params, losses):
    """params: (num,) f32, losses: (num,) f32 -> scalar f32 (Pallas forward)."""
    num = params.shape[0]
    p2d = params.astype(jnp.float32).reshape(1, num)   # metadata-only reshape
    l2d = losses.astype(jnp.float32).reshape(1, num)
    out = pl.pallas_call(
        _awl_kernel,
        out_shape=jax.ShapeDtypeStruct((1,), jnp.float32),
        in_specs=[
            pl.BlockSpec(memory_space=pltpu.MemorySpace.VMEM),
            pl.BlockSpec(memory_space=pltpu.MemorySpace.VMEM),
        ],
        out_specs=pl.BlockSpec(memory_space=pltpu.MemorySpace.SMEM),
        cost_estimate=pl.CostEstimate(
            flops=6 * num,
            transcendentals=num,
            bytes_accessed=2 * num * 4 + 4,
        ),
    )(p2d, l2d)
    return out[0]


@jax.custom_vjp
def automatic_weighted_loss(params, losses):
    return _awl_forward(params, losses)


def _awl_fwd(params, losses):
    return _awl_forward(params, losses), (params, losses)


def _awl_bwd(residuals, g):
    # Closed-form gradients (plain jnp; pallas_call has no VJP):
    #   dL/dp_i    = -loss_i / p_i^3 + 2 p_i / (1 + p_i^2)
    #   dL/dloss_i = 0.5 / p_i^2
    params, losses = residuals
    p2 = params * params
    d_params = g * (-losses / (p2 * params) + 2.0 * params / (1.0 + p2))
    d_losses = g * (0.5 / p2)
    return d_params, d_losses


automatic_weighted_loss.defvjp(_awl_fwd, _awl_bwd)


class AutomaticWeightedLossJAX:
    """Deterministic re-implementation: params initialized to ones(num)."""

    def __init__(self, num=2):
        self.num = num
        self.params = jnp.ones((num,), dtype=jnp.float32)

    def __call__(self, *losses):
        # Prefer passing a single pre-stacked (num,) array to avoid per-step
        # host-side stacking of Python scalars.
        if len(losses) == 1 and jnp.ndim(losses[0]) >= 1:
            losses_vec = jnp.asarray(losses[0], jnp.float32)
        else:
            losses_vec = jnp.stack([jnp.asarray(l, jnp.float32) for l in losses])
        return automatic_weighted_loss(self.params, losses_vec)


if __name__ == "__main__":
    key = jax.random.PRNGKey(0)
    num = 2
    # two synthetic task losses (positive scalars)
    loss_vals = jax.random.uniform(key, (num,), dtype=jnp.float32) * 3.0 + 0.1

    awl = AutomaticWeightedLossJAX(num=num)

    # forward via kernel (scalar-args path and pre-stacked path)
    out = jax.block_until_ready(awl(loss_vals[0], loss_vals[1]))
    out_stacked = jax.block_until_ready(awl(loss_vals))

    # reference check in plain JAX
    def _ref_loss(p, l):
        return jnp.sum(0.5 / (p ** 2) * l + jnp.log(1.0 + p ** 2))

    ref = _ref_loss(awl.params, loss_vals)
    assert jnp.allclose(out, ref, rtol=1e-5, atol=1e-5), (out, ref)
    assert jnp.allclose(out_stacked, ref, rtol=1e-5, atol=1e-5), (out_stacked, ref)

    # gradient check (custom_vjp closed form vs autodiff of the jnp reference)
    g_kernel = jax.grad(automatic_weighted_loss, argnums=0)(awl.params, loss_vals)
    g_ref = jax.grad(_ref_loss, argnums=0)(awl.params, loss_vals)
    g_kernel = jax.block_until_ready(g_kernel)
    assert jnp.allclose(g_kernel, g_ref, rtol=1e-5, atol=1e-5), (g_kernel, g_ref)

    print("KERNEL_OK")
</pallas_src>

<mosaic_0001>
module attributes {stable_mosaic.version = 11 : i64} {
  func.func @_awl_kernel(%arg0: memref<1x2xf32, #tpu.memory_space<vmem>>, %arg1: memref<1x2xf32, #tpu.memory_space<vmem>>, %arg2: memref<1xf32, #tpu.memory_space<smem>>) attributes {dimension_semantics = [], scalar_prefetch = 0 : i64, scratch_operands = 0 : i64, tpu.core_type = #tpu.core_type<tc>} {
    %c0 = arith.constant 0 : index
    %c0_0 = arith.constant 0 : index
    %0 = vector.load %arg0[%c0, %c0_0] : memref<1x2xf32, #tpu.memory_space<vmem>>, vector<1x2xf32>
    %c0_1 = arith.constant 0 : index
    %c0_2 = arith.constant 0 : index
    %1 = vector.load %arg1[%c0_1, %c0_2] : memref<1x2xf32, #tpu.memory_space<vmem>>, vector<1x2xf32>
    %2 = arith.mulf %0, %0 : vector<1x2xf32>
    %cst = arith.constant 5.000000e-01 : f32
    %3 = vector.broadcast %cst : f32 to vector<1x2xf32>
    %4 = arith.mulf %3, %1 : vector<1x2xf32>
    %5 = arith.divf %4, %2 : vector<1x2xf32>
    %6 = math.log1p %2 : vector<1x2xf32>
    %7 = arith.addf %5, %6 : vector<1x2xf32>
    %8 = vector.shape_cast %7 : vector<1x2xf32> to vector<1x1x2xf32>
    %cst_3 = arith.constant dense<0.000000e+00> : vector<1xf32>
    %9 = vector.multi_reduction <add>, %8, %cst_3 [1, 2] : vector<1x1x2xf32> to vector<1xf32>
    %10 = vector.shape_cast %9 : vector<1xf32> to vector<1x1x1xf32>
    %11 = vector.extract %10[0, 0, 0] : f32 from vector<1x1x1xf32>
    %c0_4 = arith.constant 0 : index
    %12 = memref.load %arg2[%c0_4] : memref<1xf32, #tpu.memory_space<smem>>
    memref.store %11, %arg2[%c0_4] : memref<1xf32, #tpu.memory_space<smem>>
    return
  }
}

</mosaic_0001>

<bundles_post_ra>
// kernel: tpu_custom_call.1
= control target key start
LH: loop header
LB: loop body
LE: loop exit
PB: predicated region body
PF: predicated region fallthrough
CT: control target
= control target key end

     0   :  { %7 = vsyncpa [#allocation3], 0  ;;  %s155_s0 = inlined_call_operand.hbm [shape: f32[1,2], index: 0, kind: input, shape index: {}]   ;;  %s156_s1 = inlined_call_operand.vmem [shape: f32[1,2], index: 1, kind: input, shape index: {}]   ;;  %s157_s2 = inlined_call_operand.hbm [shape: f32[1], index: 2, kind: output, shape index: {}]  }
   0x1   :  { %8 = vsyncpa [#allocation4], 0  ;;  %s111_s9 = smov [#allocation2]   ;;  %s75_s13 = scalar_lea.hbm %s155_s0, 16 }
   0x2   :  { %s15_s10 = sshll.u32 %s111_s9, 4  ;;  %p76_p0 = scmp.ne.s32.totalorder %s155_s0, %s75_s13  ;;  %s16_s10 = int_to_ptr.vmem [resolvable:$true] %s15_s10 }
   0x3   :  { %p79_p1 = scmp.lt.u32.totalorder %s75_s13, %s155_s0 }
   0x5   :  { %p81_p2 = pnand %p79_p1, %p76_p0 }
   0x7   :  { %84 = shalt.err (!%p81_p2)
}
   0x8   :  { %s85_s18 = scalar_lea.vmem %s16_s10, 16  ;;  %s89_s19 = scalar_lea.vmem %s16_s10, 32 }
   0x9   :  { %p86_p3 = scmp.ne.s32.totalorder %s16_s10, %s85_s18  ;;  %p90_p4 = scmp.lt.s32.totalorder %s16_s10, %s16_s10 }
   0xa   :  { %p91_p5 = scmp.lt.s32.totalorder %s89_s19, %s85_s18 }
   0xc   :  { %p92_p6 = por %p91_p5, %p90_p4 }
   0xe   :  { %p93_p7 = pnand %p92_p6, %p86_p3 }
  0x10   :  { %96 = shalt.err (!%p93_p7)
}
  0x11   :  { %18 = dma.hbm_to_vmem [thread:$0]  %s155_s0, 16, %s16_s10, [#allocation3]  }
  0x12   :  { %107 = dma.done.wait [#allocation3], 16  }
  0x13   :  { %108 = vsyncadd [#allocation3], 4294967280  ;;  %v24_v0 = vld [vmem:[#allocation2] sm:$0x1]  ;;  %vm40_vm1 = vcmask 8192   ;;  %s97_s25 = scalar_lea.hbm %s157_s2, 16 }
  0x14   :  { %v26_v1 = vmul.f32 %v24_v0, %v24_v0  ;;  %v25_v4 = vld [vmem:[%s156_s1] sm:$0x1]  ;;  %p98_p8 = scmp.ne.s32.totalorder %s157_s2, %s97_s25  ;;  %p101_p9 = scmp.lt.u32.totalorder %s97_s25, %s157_s2 }
  0x15   :  { %v27_v6 = vmul.f32 0.5, %v25_v4 }
  0x16   :  { %71 = vrcp.f32 %v26_v1  ;;  %v30_v2 = vadd.f32 1.0, %v26_v1  ;;  %v33_v3 = vmul.f32 -0.5, %v26_v1  ;;  %v36_v7 = vand.u32 2147483647, %v26_v1  ;;  %p103_p10 = pnand %p101_p9, %p98_p8 }
  0x18   :  { %73 = vlog2.f32 %v30_v2  ;;  %v34_v5 = vadd.f32 1.0, %v33_v3  ;;  %vm37_vm0 = vcmp.lt.f32.partialorder %v36_v7, 0.0004427343 }
  0x1a   :  { %v35_v9 = vmul.f32 %v34_v5, %v26_v1 }
  0x20   :  { %v72_v8 = vpop.eup %71 }
  0x21   :  { %v29_v11 = vmul.f32 %v72_v8, %v27_v6 }
  0x22   :  { %v74_v10 = vpop.eup %73 }
  0x23   :  { %v32_v12 = vmul.f32 0.6931472, %v74_v10 }
  0x25   :  { %v38_v13 = vsel %vm37_vm0, %v35_v9, %v32_v12 }
  0x26   :  { %v39_v14 = vadd.f32 %v38_v13, %v29_v11 }
  0x28   :  { %v41_v15 = vsel %vm40_vm1, %v39_v14, 0.0 }
  0x29   :  { %42 = vadd.xlane.f32.xlu0 %v41_v15 }
  0xb6   :  { %v43_v16 = vpop.xlane.xlu0 %42 }
  0xb7   :  { %v44_v17 = vrot.slane %v43_v16, 4 }
  0xb9   :  { %v45_v18 = vadd.f32 %v44_v17, %v43_v16 }
  0xbb   :  { %v46_v19 = vrot.slane %v45_v18, 2 }
  0xbd   :  { %v47_v20 = vadd.f32 %v46_v19, %v45_v18 }
  0xbf   :  { %v48_v21 = vrot.slane %v47_v20, 1 }
  0xc1   :  { %v49_v22 = vadd.f32 %v48_v21, %v47_v20 }
  0xc3   :  { %67 = vpush %v49_v22 }
  0xf4   :  { %s68_s0 = spop %67 }
  0xf5   :  { %52 = sst [smem:[#allocation5]] %s68_s0 }
  0xf6   :  { %106 = shalt.err (!%p103_p10)
}
  0xf7   :  { %s112_s30 = smov [#allocation5]  }
  0xf8   :  { %60 = dma.smem_to_hbm %s112_s30, 16, %s157_s2, [#allocation4]  }
  0xf9   :  { %109 = dma.done.wait [#allocation4], 16  }
  0xfa   :  { %110 = vsyncadd [#allocation4], 4294967280 }
  0xfb   :  { %64 = sfence }
  0xfc   :  { %65 = vsyncpa [#allocation3], 1 }
  0xfd   :  { %66 = vsyncpa [#allocation4], 1 }

</bundles_post_ra>
